<compile_context>
chip_gen: v5e
topology: v5e:2x2
jax: 0.10.0
libtpu: 0.0.40
codegen_flags: <defaults>
</compile_context>

<pallas_src>
import jax
import jax.numpy as jnp
from jax.experimental import pallas as pl
from jax.experimental.pallas import tpu as pltpu


def _ffresnet_kernel(x_ref, w_in_ref, b_in_ref,
                     w_hid_ref, b_hid_ref, mask_hid_ref,
                     mask_fin_ref, w_out_ref, b_out_ref,
                     o_ref, h_ref):
    l = pl.program_id(1)
    num_layers = pl.num_programs(1)

    # Input projection (only on the first layer step of this batch tile):
    # h = x @ W_in + b_in   -- bf16 MXU operands, f32 accumulation.
    @pl.when(l == 0)
    def _():
        h_ref[...] = (
            jnp.dot(x_ref[...].astype(jnp.bfloat16), w_in_ref[...],
                    preferred_element_type=jnp.float32)
            + b_in_ref[...])

    # Residual hidden block l: h = h + dropout(relu(h @ W_l + b_l))
    h = h_ref[...]                                      # f32 [TB, H]
    resid = (jnp.dot(h.astype(jnp.bfloat16), w_hid_ref[0],
                     preferred_element_type=jnp.float32)
             + b_hid_ref[0])
    resid = jnp.maximum(resid, 0.0) * mask_hid_ref[0]    # mask already scaled 1/(1-p)
    h_ref[...] = h + resid

    # Head (only on the last layer step): out = dropout(h) @ W_out + b_out.
    # W_out/b_out are zero-padded to a 128-lane-dense slab.
    @pl.when(l == num_layers - 1)
    def _():
        h_drop = h_ref[...] * mask_fin_ref[...]
        out = (jnp.dot(h_drop.astype(jnp.bfloat16), w_out_ref[...],
                       preferred_element_type=jnp.float32)
               + b_out_ref[...])
        o_ref[...] = out.astype(o_ref.dtype)


def feedforward_resnet(x, params, *, dropout_rate, key, batch_tile=None):
    batch, in_features = x.shape
    num_layers, num_hidden, _ = params["w_hid"].shape
    out_features = params["w_out"].shape[1]
    assert num_layers >= 1, "backbone needs at least one hidden layer"
    assert num_hidden % 128 == 0, "hidden width must be a multiple of 128 lanes"

    # ---- lane-dense padded output head -------------------------------------
    out_pad = max(128, ((out_features + 127) // 128) * 128)
    w_out_p = jnp.zeros((num_hidden, out_pad), jnp.float32)
    w_out_p = w_out_p.at[:, :out_features].set(params["w_out"])
    b_out_p = jnp.zeros((1, out_pad), jnp.float32)
    b_out_p = b_out_p.at[:, :out_features].set(params["b_out"])

    # ---- bf16 weights for the MXU; biases / accum / elementwise stay f32 ----
    w_in = params["w_in"].astype(jnp.bfloat16)
    w_hid = params["w_hid"].astype(jnp.bfloat16)
    w_out_p = w_out_p.astype(jnp.bfloat16)
    b_in = params["b_in"].astype(jnp.float32)
    b_hid = params["b_hid"].astype(jnp.float32)

    # ---- precomputed inverted-dropout masks (scaled 0 or 1/(1-p)) ----------
    if dropout_rate > 0.0:
        k_hid, k_fin = jax.random.split(key)
        keep = 1.0 - dropout_rate
        mask_hid = (jax.random.bernoulli(k_hid, keep, (num_layers, batch, num_hidden))
                    .astype(jnp.float32) / keep)
        mask_fin = (jax.random.bernoulli(k_fin, keep, (batch, num_hidden))
                    .astype(jnp.float32) / keep)
    else:
        mask_hid = jnp.ones((num_layers, batch, num_hidden), jnp.float32)
        mask_fin = jnp.ones((batch, num_hidden), jnp.float32)

    # ---- batch tiling --------------------------------------------------------
    if batch_tile is None:
        batch_tile = batch
        for cand in (256, 128, 64, 32, 16, 8):
            if batch >= cand and batch % cand == 0:
                batch_tile = cand
                break
    tb = batch_tile
    assert batch % tb == 0, "batch must be divisible by batch_tile"
    grid = (batch // tb, num_layers)

    out_padded = pl.pallas_call(
        _ffresnet_kernel,
        out_shape=jax.ShapeDtypeStruct((batch, out_pad), jnp.float32),
        grid=grid,
        in_specs=[
            pl.BlockSpec((tb, in_features), lambda b, l: (b, 0)),     # x
            pl.BlockSpec((in_features, num_hidden), lambda b, l: (0, 0)),  # w_in
            pl.BlockSpec((1, num_hidden), lambda b, l: (0, 0)),       # b_in
            pl.BlockSpec((1, num_hidden, num_hidden), lambda b, l: (l, 0, 0)),  # w_hid (per layer)
            pl.BlockSpec((1, 1, num_hidden), lambda b, l: (l, 0, 0)),  # b_hid
            pl.BlockSpec((1, tb, num_hidden), lambda b, l: (l, b, 0)),  # hidden dropout mask
            pl.BlockSpec((tb, num_hidden), lambda b, l: (b, 0)),      # final dropout mask
            pl.BlockSpec((num_hidden, out_pad), lambda b, l: (0, 0)),  # w_out (padded)
            pl.BlockSpec((1, out_pad), lambda b, l: (0, 0)),          # b_out (padded)
        ],
        out_specs=pl.BlockSpec((tb, out_pad), lambda b, l: (b, 0)),
        scratch_shapes=[pltpu.VMEM((tb, num_hidden), jnp.float32)],   # carried h
        compiler_params=pltpu.CompilerParams(
            dimension_semantics=("parallel", "arbitrary"),
            vmem_limit_bytes=48 * 1024 * 1024,  # fits v7x's 64 MiB with headroom
        ),
    )(x, w_in, b_in, w_hid, b_hid, mask_hid, mask_fin, w_out_p, b_out_p)

    return out_padded[:, :out_features]


def init_params(key, input_features, num_hidden_layers, num_hidden, output_features):
    """Deterministic init mimicking nn.Linear's U(-1/sqrt(fan_in), 1/sqrt(fan_in))."""
    ks = jax.random.split(key, 6)

    def unif(k, shape, fan_in):
        bound = 1.0 / float(fan_in) ** 0.5
        return jax.random.uniform(k, shape, jnp.float32, -bound, bound)

    return dict(
        w_in=unif(ks[0], (input_features, num_hidden), input_features),
        b_in=unif(ks[1], (1, num_hidden), input_features),
        w_hid=unif(ks[2], (num_hidden_layers, num_hidden, num_hidden), num_hidden),
        b_hid=unif(ks[3], (num_hidden_layers, 1, num_hidden), num_hidden),
        w_out=unif(ks[4], (num_hidden, output_features), num_hidden),
        b_out=unif(ks[5], (1, output_features), num_hidden),
    )


if __name__ == "__main__":
    # Small, module-consistent config.
    batch = 16
    input_features = 32
    num_hidden_layers = 2
    num_hidden = 128
    output_features = 8
    dropout_rate = 0.1

    key = jax.random.PRNGKey(0)
    pkey, xkey, dkey = jax.random.split(key, 3)
    params = init_params(pkey, input_features, num_hidden_layers,
                         num_hidden, output_features)
    x = jax.random.normal(xkey, (batch, input_features), dtype=jnp.float32)

    # batch_tile=8 exercises both grid axes: 2 batch tiles x 2 layer steps.
    out = feedforward_resnet(x, params, dropout_rate=dropout_rate,
                             key=dkey, batch_tile=8)
    jax.block_until_ready(out)
    assert out.shape == (batch, output_features)
    assert bool(jnp.all(jnp.isfinite(out)))
    print("KERNEL_OK")
</pallas_src>

<mosaic_0001>
module attributes {stable_mosaic.version = 11 : i64} {
  func.func @_ffresnet_kernel(%arg0: i32, %arg1: i32, %arg2: memref<8x32xf32, #tpu.memory_space<vmem>>, %arg3: memref<32x128xbf16, #tpu.memory_space<vmem>>, %arg4: memref<1x128xf32, #tpu.memory_space<vmem>>, %arg5: memref<1x128x128xbf16, #tpu.memory_space<vmem>>, %arg6: memref<1x1x128xf32, #tpu.memory_space<vmem>>, %arg7: memref<1x8x128xf32, #tpu.memory_space<vmem>>, %arg8: memref<8x128xf32, #tpu.memory_space<vmem>>, %arg9: memref<128x128xbf16, #tpu.memory_space<vmem>>, %arg10: memref<1x128xf32, #tpu.memory_space<vmem>>, %arg11: memref<8x128xf32, #tpu.memory_space<vmem>>, %arg12: memref<8x128xf32, #tpu.memory_space<vmem>>) attributes {dimension_semantics = [#tpu.dimension_semantics<parallel>, #tpu.dimension_semantics<arbitrary>], iteration_bounds = array<i64: 2, 2>, scalar_prefetch = 0 : i64, scratch_operands = 1 : i64, tpu.core_type = #tpu.core_type<tc>, window_params = [{transform_indices = @transform_0, window_bounds = array<i64: 8, 32>}, {pipeline_mode = #tpu.pipeline_mode<synchronous>, transform_indices = @transform_1, window_bounds = array<i64: 32, 128>}, {pipeline_mode = #tpu.pipeline_mode<synchronous>, transform_indices = @transform_2, window_bounds = array<i64: 1, 128>}, {transform_indices = @transform_3, window_bounds = array<i64: 1, 128, 128>}, {transform_indices = @transform_4, window_bounds = array<i64: 1, 1, 128>}, {transform_indices = @transform_5, window_bounds = array<i64: 1, 8, 128>}, {transform_indices = @transform_6, window_bounds = array<i64: 8, 128>}, {pipeline_mode = #tpu.pipeline_mode<synchronous>, transform_indices = @transform_7, window_bounds = array<i64: 128, 128>}, {pipeline_mode = #tpu.pipeline_mode<synchronous>, transform_indices = @transform_8, window_bounds = array<i64: 1, 128>}, {transform_indices = @transform_9, window_bounds = array<i64: 8, 128>}]} {
    %c0_i32 = arith.constant 0 : i32
    %0 = arith.cmpi eq, %arg1, %c0_i32 : i32
    %1 = arith.extui %0 : i1 to i32
    %c0_i32_0 = arith.constant 0 : i32
    %2 = arith.cmpi ne, %1, %c0_i32_0 : i32
    scf.if %2 {
      %c0_15 = arith.constant 0 : index
      %c0_16 = arith.constant 0 : index
      %22 = vector.load %arg2[%c0_15, %c0_16] : memref<8x32xf32, #tpu.memory_space<vmem>>, vector<8x32xf32>
      %23 = arith.truncf %22 : vector<8x32xf32> to vector<8x32xbf16>
      %c0_17 = arith.constant 0 : index
      %c0_18 = arith.constant 0 : index
      %24 = vector.load %arg3[%c0_17, %c0_18] : memref<32x128xbf16, #tpu.memory_space<vmem>>, vector<32x128xbf16>
      %cst_19 = arith.constant dense<0.000000e+00> : vector<8x128xf32>
      %25 = tpu.matmul %23, %24, %cst_19 {dimension_numbers = #tpu.dot_dimension_numbers<[1], [0], [0], [1], [0, 0, 1, 1], [], []>} : vector<8x32xbf16>, vector<32x128xbf16>, vector<8x128xf32> -> vector<8x128xf32>
      %c0_20 = arith.constant 0 : index
      %c0_21 = arith.constant 0 : index
      %26 = vector.load %arg4[%c0_20, %c0_21] : memref<1x128xf32, #tpu.memory_space<vmem>>, vector<1x128xf32>
      %27 = vector.broadcast %26 : vector<1x128xf32> to vector<8x128xf32>
      %28 = arith.addf %25, %27 : vector<8x128xf32>
      %c0_22 = arith.constant 0 : index
      %c0_23 = arith.constant 0 : index
      %29 = vector.load %arg12[%c0_22, %c0_23] : memref<8x128xf32, #tpu.memory_space<vmem>>, vector<8x128xf32>
      tpu.vector_store %arg12[%c0_22, %c0_23], %28 {strides = array<i32>} : memref<8x128xf32, #tpu.memory_space<vmem>>, vector<8x128xf32>,
    } else {
    }
    %c0 = arith.constant 0 : index
    %c0_1 = arith.constant 0 : index
    %3 = vector.load %arg12[%c0, %c0_1] : memref<8x128xf32, #tpu.memory_space<vmem>>, vector<8x128xf32>
    %4 = arith.truncf %3 : vector<8x128xf32> to vector<8x128xbf16>
    %c0_2 = arith.constant 0 : index
    %c0_3 = arith.constant 0 : index
    %c0_4 = arith.constant 0 : index
    %5 = vector.load %arg5[%c0_2, %c0_3, %c0_4] : memref<1x128x128xbf16, #tpu.memory_space<vmem>>, vector<1x128x128xbf16>
    %6 = vector.shape_cast %5 : vector<1x128x128xbf16> to vector<128x128xbf16>
    %cst = arith.constant dense<0.000000e+00> : vector<8x128xf32>
    %7 = tpu.matmul %4, %6, %cst {dimension_numbers = #tpu.dot_dimension_numbers<[1], [0], [0], [1], [0, 0, 1, 1], [], []>} : vector<8x128xbf16>, vector<128x128xbf16>, vector<8x128xf32> -> vector<8x128xf32>
    %c0_5 = arith.constant 0 : index
    %c0_6 = arith.constant 0 : index
    %c0_7 = arith.constant 0 : index
    %8 = vector.load %arg6[%c0_5, %c0_6, %c0_7] : memref<1x1x128xf32, #tpu.memory_space<vmem>>, vector<1x1x128xf32>
    %9 = vector.shape_cast %8 : vector<1x1x128xf32> to vector<1x128xf32>
    %10 = vector.broadcast %9 : vector<1x128xf32> to vector<8x128xf32>
    %11 = arith.addf %7, %10 : vector<8x128xf32>
    %cst_8 = arith.constant 0.000000e+00 : f32
    %12 = vector.broadcast %cst_8 : f32 to vector<8x128xf32>
    %13 = arith.maximumf %11, %12 : vector<8x128xf32>
    %c0_9 = arith.constant 0 : index
    %c0_10 = arith.constant 0 : index
    %c0_11 = arith.constant 0 : index
    %14 = vector.load %arg7[%c0_9, %c0_10, %c0_11] : memref<1x8x128xf32, #tpu.memory_space<vmem>>, vector<1x8x128xf32>
    %15 = vector.shape_cast %14 : vector<1x8x128xf32> to vector<8x128xf32>
    %16 = arith.mulf %13, %15 : vector<8x128xf32>
    %17 = arith.addf %3, %16 : vector<8x128xf32>
    %c0_12 = arith.constant 0 : index
    %c0_13 = arith.constant 0 : index
    %18 = vector.load %arg12[%c0_12, %c0_13] : memref<8x128xf32, #tpu.memory_space<vmem>>, vector<8x128xf32>
    tpu.vector_store %arg12[%c0_12, %c0_13], %17 {strides = array<i32>} : memref<8x128xf32, #tpu.memory_space<vmem>>, vector<8x128xf32>,
    %c1_i32 = arith.constant 1 : i32
    %19 = arith.cmpi eq, %arg1, %c1_i32 : i32
    %20 = arith.extui %19 : i1 to i32
    %c0_i32_14 = arith.constant 0 : i32
    %21 = arith.cmpi ne, %20, %c0_i32_14 : i32
    scf.if %21 {
      %c0_15 = arith.constant 0 : index
      %c0_16 = arith.constant 0 : index
      %22 = vector.load %arg12[%c0_15, %c0_16] : memref<8x128xf32, #tpu.memory_space<vmem>>, vector<8x128xf32>
      %c0_17 = arith.constant 0 : index
      %c0_18 = arith.constant 0 : index
      %23 = vector.load %arg8[%c0_17, %c0_18] : memref<8x128xf32, #tpu.memory_space<vmem>>, vector<8x128xf32>
      %24 = arith.mulf %22, %23 : vector<8x128xf32>
      %25 = arith.truncf %24 : vector<8x128xf32> to vector<8x128xbf16>
      %c0_19 = arith.constant 0 : index
      %c0_20 = arith.constant 0 : index
      %26 = vector.load %arg9[%c0_19, %c0_20] : memref<128x128xbf16, #tpu.memory_space<vmem>>, vector<128x128xbf16>
      %cst_21 = arith.constant dense<0.000000e+00> : vector<8x128xf32>
      %27 = tpu.matmul %25, %26, %cst_21 {dimension_numbers = #tpu.dot_dimension_numbers<[1], [0], [0], [1], [0, 0, 1, 1], [], []>} : vector<8x128xbf16>, vector<128x128xbf16>, vector<8x128xf32> -> vector<8x128xf32>
      %c0_22 = arith.constant 0 : index
      %c0_23 = arith.constant 0 : index
      %28 = vector.load %arg10[%c0_22, %c0_23] : memref<1x128xf32, #tpu.memory_space<vmem>>, vector<1x128xf32>
      %29 = vector.broadcast %28 : vector<1x128xf32> to vector<8x128xf32>
      %30 = arith.addf %27, %29 : vector<8x128xf32>
      %c0_24 = arith.constant 0 : index
      %c0_25 = arith.constant 0 : index
      %31 = vector.load %arg11[%c0_24, %c0_25] : memref<8x128xf32, #tpu.memory_space<vmem>>, vector<8x128xf32>
      tpu.vector_store %arg11[%c0_24, %c0_25], %30 {strides = array<i32>} : memref<8x128xf32, #tpu.memory_space<vmem>>, vector<8x128xf32>,
    } else {
    }
    return
  }
  func.func @transform_0(%arg0: i32, %arg1: i32) -> (i32, i32) {
    %c0_i32 = arith.constant 0 : i32
    %c0_i32_0 = arith.constant 0 : i32
    return %arg0, %c0_i32 : i32, i32
  }
  func.func @transform_1(%arg0: i32, %arg1: i32) -> (i32, i32) {
    %c0_i32 = arith.constant 0 : i32
    %c0_i32_0 = arith.constant 0 : i32
    %c0_i32_1 = arith.constant 0 : i32
    return %c0_i32, %c0_i32_0 : i32, i32
  }
  func.func @transform_2(%arg0: i32, %arg1: i32) -> (i32, i32) {
    %c0_i32 = arith.constant 0 : i32
    %c0_i32_0 = arith.constant 0 : i32
    %c0_i32_1 = arith.constant 0 : i32
    return %c0_i32, %c0_i32_0 : i32, i32
  }
  func.func @transform_3(%arg0: i32, %arg1: i32) -> (i32, i32, i32) {
    %c0_i32 = arith.constant 0 : i32
    %c0_i32_0 = arith.constant 0 : i32
    %c0_i32_1 = arith.constant 0 : i32
    return %arg1, %c0_i32, %c0_i32_0 : i32, i32, i32
  }
  func.func @transform_4(%arg0: i32, %arg1: i32) -> (i32, i32, i32) {
    %c0_i32 = arith.constant 0 : i32
    %c0_i32_0 = arith.constant 0 : i32
    %c0_i32_1 = arith.constant 0 : i32
    return %arg1, %c0_i32, %c0_i32_0 : i32, i32, i32
  }
  func.func @transform_5(%arg0: i32, %arg1: i32) -> (i32, i32, i32) {
    %c0_i32 = arith.constant 0 : i32
    %c0_i32_0 = arith.constant 0 : i32
    return %arg1, %arg0, %c0_i32 : i32, i32, i32
  }
  func.func @transform_6(%arg0: i32, %arg1: i32) -> (i32, i32) {
    %c0_i32 = arith.constant 0 : i32
    %c0_i32_0 = arith.constant 0 : i32
    return %arg0, %c0_i32 : i32, i32
  }
  func.func @transform_7(%arg0: i32, %arg1: i32) -> (i32, i32) {
    %c0_i32 = arith.constant 0 : i32
    %c0_i32_0 = arith.constant 0 : i32
    %c0_i32_1 = arith.constant 0 : i32
    return %c0_i32, %c0_i32_0 : i32, i32
  }
  func.func @transform_8(%arg0: i32, %arg1: i32) -> (i32, i32) {
    %c0_i32 = arith.constant 0 : i32
    %c0_i32_0 = arith.constant 0 : i32
    %c0_i32_1 = arith.constant 0 : i32
    return %c0_i32, %c0_i32_0 : i32, i32
  }
  func.func @transform_9(%arg0: i32, %arg1: i32) -> (i32, i32) {
    %c0_i32 = arith.constant 0 : i32
    %c0_i32_0 = arith.constant 0 : i32
    return %arg0, %c0_i32 : i32, i32
  }
}

</mosaic_0001>

<bundles_post_ra>
// kernel: tpu_custom_call.1
= control target key start
LH: loop header
LB: loop body
LE: loop exit
PB: predicated region body
PF: predicated region fallthrough
CT: control target
= control target key end

     0   :  { %s2039_s0 = inlined_call_operand.hbm [shape: f32[16,32], index: 0, kind: input, shape index: {}]   ;;  %s2040_s1 = inlined_call_operand.hbm [shape: bf16[32,128], index: 1, kind: input, shape index: {}]   ;;  %s2041_s2 = inlined_call_operand.vmem [shape: f32[1,128], index: 2, kind: input, shape index: {}]   ;;  %s2042_s3 = inlined_call_operand.hbm [shape: bf16[2,128,128], index: 3, kind: input, shape index: {}]   ;;  %s2043_s4 = inlined_call_operand.vmem [shape: f32[2,1,128], index: 4, kind: input, shape index: {}]   ;;  %s2044_s5 = inlined_call_operand.hbm [shape: f32[2,16,128], index: 5, kind: input, shape index: {}]   ;;  %s2045_s6 = inlined_call_operand.hbm [shape: f32[16,128], index: 6, kind: input, shape index: {}]   ;;  %s2046_s7 = inlined_call_operand.hbm [shape: bf16[128,128], index: 7, kind: input, shape index: {}]   ;;  %s2047_s8 = inlined_call_operand.vmem [shape: f32[1,128], index: 8, kind: input, shape index: {}]   ;;  %s2048_s9 = inlined_call_operand.hbm [shape: f32[16,128], index: 9, kind: output, shape index: {}]  }
   0x1   :  { %2068 = sst [smem:[#allocation34_spill]] %s2039_s0 }
   0x2   :  { %2069 = sst [smem:[#allocation35_spill]] %s2040_s1 }
   0x3   :  { %2070 = sst [smem:[#allocation36_spill]] %s2041_s2 }
   0x4   :  { %2071 = sst [smem:[#allocation37_spill]] %s2042_s3 }
   0x5   :  { %2072 = sst [smem:[#allocation38_spill]] %s2043_s4 }
   0x6   :  { %2073 = sst [smem:[#allocation39_spill]] %s2046_s7 }
   0x7   :  { %2074 = sst [smem:[#allocation40_spill]] %s2047_s8 }
   0x8   :  { %2075 = sst [smem:[#allocation41_spill]] %s2048_s9 }
   0x9   :  { %14 = vsyncpa [#allocation4], 0 }
   0xa   :  { %16 = vsyncpa [#allocation4 + $0x1], 0 }
   0xb   :  { %17 = vsyncpa [#allocation7], 0 }
   0xc   :  { %18 = vsyncpa [#allocation5], 0 }
   0xd   :  { %20 = vsyncpa [#allocation5 + $0x1], 0  ;;  %s1625_s30 = smov 0   ;;  %s1627_s10 = smov 0  }
   0xe   :  { %s1629_s11 = smov 0   ;;  %s1631_s12 = smov 0  }
   0xf   :  { %s1633_s13 = smov 0   ;;  %s1635_s14 = smov 0  }
  0x10   :  { %s1637_s15 = smov 0   ;;  %s1639_s16 = smov 0  }
  0x11   :  { %s1641_s17 = smov 0   ;;  %s1643_s18 = smov 0  }
  0x12   :  { %s1645_s19 = smov 0   ;;  %s1647_s20 = smov 0  }
  0x13   :  { %s1649_s21 = smov 0   ;;  %s1651_s22 = smov 0  }
  0x14 LB: > { %2076 = sst [smem:[#allocation20_spill]] %s1533_s13  ;;  %s1696_s23 = sadd.s32 4294967295, %s1569_s22   ;;  %s1569_s22 = sphi %s1651_s22, %s26_s22   ;;  %s1565_s21 = sphi %s1649_s21, %s2145_s21   ;;  %s1561_s20 = sphi %s1647_s20, %s2144_s20   ;;  %s1557_s19 = sphi %s1645_s19, %s2143_s19   ;;  %s1553_s18 = sphi %s1643_s18, %s2142_s18   ;;  %s1549_s17 = sphi %s1641_s17, %s2131_s17   ;;  %s1545_s16 = sphi %s1639_s16, %s2130_s16   ;;  %s1541_s15 = sphi %s1637_s15, %s2141_s15   ;;  %s1537_s14 = sphi %s1635_s14, %s2140_s14   ;;  %s1533_s13 = sphi %s1633_s13, %s2139_s13   ;;  %s1529_s12 = sphi %s1631_s12, %s2138_s12   ;;  %s1525_s11 = sphi %s1629_s11, %s2137_s11   ;;  %s1521_s10 = sphi %s1627_s10, %s2136_s10   ;;  %s1517_s30 = sphi %s1625_s30, %s2135_s30  }
  0x15   : > { %2077 = sst [smem:[#allocation21_spill]] %s1541_s15  ;;  %s935_s24 = sadd.s32 4294967294, %s1569_s22  }
  0x16   : > { %2078 = sst [smem:[#allocation22_spill]] %s1545_s16  ;;  %s35_s25 = sadd.s32 1, %s1561_s20 }
  0x17   : > { %2079 = sst [smem:[#allocation23_spill]] %s1549_s17  ;;  %s38_s26 = sadd.s32 1, %s1565_s21 }
  0x18   : > { %2080 = sst [smem:[#allocation24_spill]] %s1553_s18  ;;  %p36_p0 = scmp.ge.s32.totalorder %s35_s25, 2 }
  0x19   : > { %2081 = sst [smem:[#allocation25_spill]] %s1557_s19  ;;  %s45_s27 = sadd.s32 1, %s1549_s17 }
  0x1a   : > { %p52_p1 = scmp.ne.s32.totalorder %s1549_s17, %s1545_s16  ;;  %p53_p2 = scmp.eq.s32.totalorder %s1569_s22, 0 }
  0x1b   : > { %s2147_s25 = smov (%p36_p0, %s35_s25), 0  ;;  %s2149_s26 = smov (!%p36_p0, %s38_s26), %s1565_s21 }
  0x1c   : > { %2082 = sst [smem:[#allocation26_spill]] %s2147_s25  ;;  %p1713_p3 = por %p53_p2, %p52_p1 }
  0x1d   : > { %p58_p4 = scmp.ne.s32.totalorder %s1545_s16, %s1541_s15  ;;  %p40_p5 = scmp.ge.s32.totalorder %s2149_s26, 2 }
  0x1e   : > { %p59_p6 = scmp.eq.s32.totalorder %s1696_s23, 0  ;;  %s110_s29 = ssub.s32 %s1561_s20, %s2147_s25 }
  0x1f   : > { %s113_s9 = sadd.s32 1, %s1537_s14  ;;  %s2151_s26 = smov (%p40_p5, %s2149_s26), 0 }
  0x20   : > { %2084 = sst [smem:[#allocation27_spill]] %s2151_s26  ;;  %p1730_p7 = por %p59_p6, %p58_p4 }
  0x21   : > { %p111_p8 = scmp.eq.s32.totalorder %s110_s29, 0  ;;  %s42_s8 = ssub.s32 %s1565_s21, %s2151_s26 }
  0x22   : > { %s2085_s19 = scalar_select %p1730_p7, 1, 0 }
  0x23   : > { %p120_p9 = scmp.ne.s32.totalorder %s1537_s14, %s1533_s13  ;;  %p43_p10 = scmp.eq.s32.totalorder %s42_s8, 0 }
  0x24   : > { %2086 = sst [smem:[#allocation28_spill]] %s2085_s19  ;;  %p126_p11 = scmp.ne.s32.totalorder %s1533_s13, %s1529_s12 }
  0x25   : > { %s1741_s25 = scalar_select %p111_p8, %s1537_s14, %s113_s9  }
  0x26   : > { %s1744_s2 = scalar_select %p43_p10, %s1549_s17, %s45_s27  }
  0x27   : > { %2087 = sst [smem:[#allocation29_spill]] %s1741_s25  ;;  %p1748_p12 = por %p120_p9, %p53_p2 }
  0x28   : > { %2088 = sst [smem:[#allocation30_spill]] %s1744_s2  ;;  %p1754_p13 = por %p126_p11, %p59_p6 }
  0x29   : > { %s164_s26 = sor.u32 %s110_s29, %s42_s8  ;;  %p272_p0 = scmp.eq.s32.totalorder %s1696_s23, 3 }
  0x2a   : > { %s2090_s18 = scalar_select %p1754_p13, 1, 0 }
  0x2b   : > { %p1759_p5 = scmp.eq.s32.totalorder %s164_s26, 0  ;;  %p278_p8 = scmp.eq.s32.totalorder %s935_s24, 3 }
  0x2c   : > { %2091 = sst [smem:[#allocation31_spill]] %s2090_s18  ;;  %p1766_p9 = por %p272_p0, %p52_p1 }
  0x2d   : > { %p1773_p10 = por %p278_p8, %p58_p4  ;;  %p2065_p11 = scmp.lt.s32.totalorder %s1569_s22, 4 }
  0x2e   : > { %s2093_s9 = scalar_select %p1766_p9, 1, 0 }
  0x2f   : > { %s2095_s27 = scalar_select %p1773_p10, 1, 0 }
  0x30   : > { %2094 = sst [smem:[#allocation32_spill]] %s2093_s9  ;;  %s332_s8 = sand.u32 1, %s1569_s22  }
  0x31   : > { %2096 = sst [smem:[#allocation33_spill]] %s2095_s27  ;;  %s334_s26 = sand.u32 1, %s1549_s17  }
  0x32   : > { %s1780_s29 = sshll.u32 %s334_s26, 3  ;;  %s941_s2 = sshll.u32 %s1565_s21, 3 }
  0x33   : > { %s2097_s0 = sld [smem:[#allocation34_spill]]  ;;  %s336_s9 = scalar_lea.vmem [#allocation3], %s1780_s29 }
  0x34   : > { %s344_s15 = sshll.u32 %s336_s9, 4  ;;  %p1791_p1 = pnand %p2065_p11, %p1713_p3  ;;  %s345_s15 = int_to_ptr.vmem [resolvable:$true] %s344_s15 }
  0x35   : > { %p1799_p4 = pnand %p2065_p11, %p1748_p12  ;;  %s1808_s28 = scalar_lea.sflag [#allocation4], %s332_s8 }
  0x36   : > { %s353_s4 = sand.u32 1, %s1537_s14   ;;  %s1037_s9 = sshll.u32 %s1561_s20, 6 }
  0x37   : > { %s2100_s3 = sld [smem:[#allocation37_spill]]  ;;  %s2066_s8 = smov 64  }
  0x38   : > { %p936_p3 = scmp.ge.s32.totalorder %s1569_s22, 1  ;;  %p285_p12 = scmp.lt.s32.totalorder %s1569_s22, 5 }
  0x39   : > { %s340_s18 = scalar_lea.hbm %s2097_s0, %s941_s2  ;;  %s942_s0 = sshll.u32 %s353_s4, 6 }
  0x3a   : > { %s342_s13 = sshll.u32 %s340_s18, 4  ;;  %s1806_s18 = scalar_lea.hbm %s2045_s6, %s941_s2  ;;  %s343_s13 = int_to_ptr.hbm [resolvable:$true] %s342_s13 }
  0x3b   : > { %1084 = dma.hbm_to_vmem [thread:$0]  (!%p1791_p1), %s343_s13, 128, %s345_s15, %s1808_s28  }
  0x3c   : > { %s355_s25 = scalar_lea.vmem [#allocation8], %s942_s0  ;;  %s2067_s13 = smov 4  }
  0x3d   : > { %s360_s16 = scalar_lea.hbm %s2100_s3, %s1037_s9  ;;  %s363_s2 = sshll.u32 %s355_s25, 4  ;;  %s364_s2 = int_to_ptr.vmem [resolvable:$true] %s363_s2 }
  0x3e   : > { %s361_s7 = sshll.u32 %s360_s16, 4  ;;  %s2101_s1 = sld [smem:[#allocation35_spill]]  ;;  %s362_s7 = int_to_ptr.hbm [resolvable:$true] %s361_s7 }
  0x3f   : > { %1087 = dma.hbm_to_vmem [thread:$0]  (!%p1799_p4), %s362_s7, 1024, %s364_s2, %s1808_s28, %s2066_s8, %s2066_s8, %s2067_s13  }
  0x40   : > { %p1829_p0 = pnand %p936_p3, %p285_p12  ;;  %s1573_s19 = smov [#allocation6]  }
  0x41   : > { %s298_s7 = sshll.u32 %s1573_s19, 4  ;;  %s167_s24 = sadd.s32 1, %s1525_s11  ;;  %s299_s7 = int_to_ptr.vmem [resolvable:$true] %s298_s7 }
  0x42   : > { %p1074_p8 = pneg %p1829_p0  ;;  %p174_p11 = scmp.ne.s32.totalorder %s1525_s11, %s1521_s10 }
  0x43   : > { %s1852_s4 = scalar_select %p1759_p5, %s1525_s11, %s167_s24  }
  0x44   : > { %s296_s16 = sshll.u32 %s2101_s1, 4  ;;  %p1837_p4 = pnand %p1074_p8, %p59_p6  ;;  %s297_s16 = int_to_ptr.hbm [resolvable:$true] %s296_s16 }
  0x45   : > { %p1856_p3 = por %p174_p11, %p53_p2  ;;  %p180_p12 = scmp.ne.s32.totalorder %s1521_s10, %s1517_s30 }
  0x46   : > { %1077 = dma.hbm_to_vmem [thread:$0]  (!%p1837_p4), %s297_s16, 256, %s299_s7, [#allocation7], %s2066_s8, %s2066_s8, %s2067_s13  }
  0x47   : > { %s381_s25 = sand.u32 1, %s1525_s11   ;;  %s946_s2 = sshll.u32 %s1561_s20, 1 }
  0x48   : > { %p1866_p8 = por %p180_p12, %p59_p6  ;;  %s945_s15 = sshll.u32 %s381_s25, 3 }
  0x49   : > { %s387_s12 = sadd.s32 %s1565_s21, %s946_s2  ;;  %s383_s19 = scalar_lea.vmem [#allocation9], %s945_s15 }
  0x4a   : > { %s947_s16 = sshll.u32 %s387_s12, 3  ;;  %s393_s7 = sshll.u32 %s383_s19, 4  ;;  %s394_s7 = int_to_ptr.vmem [resolvable:$true] %s393_s7 }
  0x4b   : > { %s389_s30 = scalar_lea.hbm %s2044_s5, %s947_s16  ;;  %p2106_p2 = scmp.lt.s32.totalorder %s1569_s22, 4 }
  0x4c   : > { %s391_s13 = sshll.u32 %s389_s30, 4  ;;  %s2107_s2 = sld [smem:[#allocation39_spill]]  ;;  %s392_s13 = int_to_ptr.hbm [resolvable:$true] %s391_s13 }
  0x4d   : > { %p1088_p5 = pnand %p2106_p2, %p1856_p3  ;;  %s410_s15 = sshll.u32 %s1806_s18, 4  ;;  %s411_s15 = int_to_ptr.hbm [resolvable:$true] %s410_s15 }
  0x4e   : > { %s1574_s19 = smov [#allocation11]   ;;  %s404_s8 = scalar_lea.vmem [#allocation10], %s1780_s29 }
  0x4f   : > { %1090 = dma.hbm_to_vmem [thread:$0]  (!%p1088_p5), %s392_s13, 128, %s394_s7, %s1808_s28  }
  0x50   : > { %s315_s3 = sshll.u32 %s1574_s19, 4  ;;  %s412_s16 = sshll.u32 %s404_s8, 4  ;;  %s316_s3 = int_to_ptr.vmem [resolvable:$true] %s315_s3  ;;  %s413_s16 = int_to_ptr.vmem [resolvable:$true] %s412_s16 }
  0x51   : > { %s2108_s24 = smov 4   ;;  %s2109_s30 = smov 64  }
  0x52   : > { %s313_s12 = sshll.u32 %s2107_s2, 4  ;;  %421 = sbr.rel (%p1829_p0) target bundleno = 625 (0x271), region = 56  ;;  %s314_s12 = int_to_ptr.hbm [resolvable:$true] %s313_s12 }
  0x53   : > { %1080 = dma.hbm_to_vmem [thread:$0]  (!%p1837_p4), %s314_s12, 1024, %s316_s3, [#allocation7], %s2109_s30, %s2109_s30, %s2108_s24  }
  0x54   : > { %1093 = dma.hbm_to_vmem [thread:$0]  (!%p1791_p1), %s411_s15, 128, %s413_s16, %s1808_s28  }
  0x55   : > { %s2110_s1 = sld [smem:[#allocation22_spill]] (!%p1829_p0)  ;;  %s423_s13 = sand.u32 (!%p1829_p0), 1, %s1696_s23  }
  0x56   : > { %s424_s26 = scalar_lea.sflag (!%p1829_p0), [#allocation4], %s423_s13 }
  0x5b   : > { %s425_s9 = sand.u32 1, %s2110_s1  }
  0x5c   : > { %s1898_s29 = sshll.u32 %s425_s9, 3 }
  0x5d   : > { %s427_s7 = scalar_lea.vmem [#allocation3], %s1898_s29 }
  0x5e   : > { %1488 = dma.done.wait (%p1730_p7), %s424_s26, 128  }
  0x5f   : > { %1490 = vsyncadd (%p1730_p7), %s424_s26, 4294967168 }
  0x60   : > { %1492 = dma.done.wait (%p59_p6), [#allocation7], 256  }
  0x61   : > { %1494 = vsyncadd (%p59_p6), [#allocation7], 4294967040  ;;  %s2112_s3 = sld [smem:[#allocation20_spill]] }
  0x67   : > { %s440_s28 = sand.u32 1, %s2112_s3  }
  0x68   : > { %s953_s17 = sshll.u32 %s440_s28, 6 }
  0x69   : > { %s1910_s25 = scalar_lea.vmem [#allocation8], %s953_s17 }
  0x6a   : > { %1496 = dma.done.wait (%p1754_p13), %s424_s26, 1024  }
  0x6b   : > { %1498 = vsyncadd (%p1754_p13), %s424_s26, 4294966272  ;;  %s450_s2 = sand.u32 1, %s1521_s10  }
  0x6c   : > { %s1917_s12 = sshll.u32 %s450_s2, 3 }
  0x6d   : > { %s452_s15 = scalar_lea.vmem [#allocation9], %s1917_s12 }
  0x6e   : > { %1500 = dma.done.wait (%p1866_p8), %s424_s26, 128  }
  0x6f   : > { %1502 = vsyncadd (%p1866_p8), %s424_s26, 4294967168  ;;  %s462_s19 = scalar_lea.vmem [#allocation10], %s1898_s29 }
  0x70   : > { %1504 = dma.done.wait (%p1730_p7), %s424_s26, 128  }
  0x71   : > { %1506 = vsyncadd (%p1730_p7), %s424_s26, 4294967168 }
  0x72   : > { %1508 = dma.done.wait (%p59_p6), [#allocation7], 1024  }
  0x73   : > { %1510 = vsyncadd (%p59_p6), [#allocation7], 4294966272  ;;  %s2114_s8 = sld [smem:[#allocation24_spill]]  ;;  %s520_s13 = scalar_lea.vmem [#allocation12], %s1898_s29 }
  0x74   : > { %s2115_s30 = sld [smem:[#allocation38_spill]] }
  0x79   : > { %p521_p13 = scmp.lt.s32.totalorder %s2114_s8, 1  ;;  %p958_p7 = scmp.ne.s32.totalorder %s2114_s8, 0 }
  0x7a   : > { %s2116_s26 = sld [smem:[#allocation36_spill]] (!%p958_p7) }
  0x7b   : > { %s1935_s0 = scalar_select %p521_p13, %s2114_s8, 1 }
  0x7c   : > { %528 = sbr.rel (%p958_p7) target bundleno = 271 (0x10f), region = 84 }
  0x7d   : > { %s523_s1 = scalar_lea.vmem %s2115_s30, %s1935_s0 }
  0x81   : > { %v1039_v0 = vld [vmem:[#allocation6 + $0x8] sm:$0xff]  ;;  %v1038_v1 = vld [vmem:[#allocation6] sm:$0xff]  ;;  %v529_v2 = vld [vmem:[%s427_s7] sm:$0xff]  ;;  %vm551_vm0 = vcmask 261120  }
  0x82   : > { %561 = vmatpush.bf16.msra.mxu0 %v1039_v0  ;;  %v530_v3 = vpack.c.bf16 %v529_v2, %v529_v2  ;;  %v1220_v4 = vld [vmem:[%s2116_s26] ss:$0 sm:$0xff] }
  0x86   : > { %562 = vmatpush.bf16.msra.mxu0 %v1038_v1 }
  0x89   : > { %967 = vmatmul.msk.bf16.vlgmr.msra.gmra.mxu0 %vm551_vm0, %v530_v3 }
 0x106   : > { %v564_v5 = vpop.f32.mrf.mxu0 }
 0x107   : > { %v565_v6 = vadd.f32 %v1220_v4, %v564_v5 }
 0x109   : > { %568 = vst [vmem:[#allocation2] sm:$0xff] %v565_v6 }
 0x10e   : > { %v566_v7 = vpop.f32.mrf.mxu0 }
 0x10f PF: > { %v1047_v8 = vld [vmem:[%s1910_s25 + $0x38] sm:$0xff]  ;;  %v1046_v9 = vld [vmem:[%s1910_s25 + $0x30] sm:$0xff]  ;;  %v1045_v10 = vld [vmem:[%s1910_s25 + $0x28] sm:$0xff]  ;;  %s2118_s28 = sld [smem:[#allocation24_spill]] }
 0x110   : > { %639 = vmatpush.bf16.msra.mxu0 %v1047_v8  ;;  %v1044_v11 = vld [vmem:[%s1910_s25 + $0x20] sm:$0xff]  ;;  %v1043_v12 = vld [vmem:[%s1910_s25 + $0x18] sm:$0xff]  ;;  %v1042_v13 = vld [vmem:[%s1910_s25 + $0x10] sm:$0xff] }
 0x111   : > { %v1041_v14 = vld [vmem:[%s1910_s25 + $0x8] sm:$0xff]  ;;  %v1040_v15 = vld [vmem:[%s1910_s25] sm:$0xff]  ;;  %v569_v16 = vld [vmem:[#allocation2] sm:$0xff] }
 0x112   : > { %v570_v17 = vpack.c.bf16 %v569_v16, %v569_v16  ;;  %v1221_v18 = vld [vmem:[%s523_s1] ss:$0 sm:$0xff]  ;;  %v653_v21 = vld [vmem:[%s452_s15] sm:$0xff] }
 0x114   : > { %640 = vmatpush.bf16.msra.mxu0 %v1046_v9 }
 0x115   : > { %p1000_p6 = scmp.ne.s32.totalorder %s2118_s28, 1 }
 0x116   : > { %s2119_s2 = sld [smem:[#allocation40_spill]] (!%p1000_p6) }
 0x118   : > { %641 = vmatpush.bf16.msra.mxu0 %v1045_v10 }
 0x11c   : > { %642 = vmatpush.bf16.msra.mxu0 %v1044_v11 }
 0x120   : > { %643 = vmatpush.bf16.msra.mxu0 %v1043_v12 }
 0x124   : > { %644 = vmatpush.bf16.msra.mxu0 %v1042_v13 }
 0x128   : > { %645 = vmatpush.bf16.msra.mxu0 %v1041_v14 }
 0x12c   : > { %646 = vmatpush.bf16.msra.mxu0 %v1040_v15 }
 0x12f   : > { %647 = vmatmul.bf16.vlgmr.msra.gmra.mxu0 %v570_v17 }
 0x1ac   : > { %v648_v19 = vpop.f32.mrf.mxu0 }
 0x1ad   : > { %v649_v20 = vadd.f32 %v1221_v18, %v648_v19 }
 0x1af   : > { %v652_v22 = vmax.f32 %v649_v20, 0.0 }
 0x1b1   : > { %v654_v23 = vmul.f32 %v653_v21, %v652_v22  ;;  %660 = sbr.rel (%p1000_p6) target bundleno = 604 (0x25c), region = 88 }
 0x1b3   : > { %v655_v24 = vadd.f32 %v654_v23, %v569_v16 }
 0x1b4   : > { %v650_v25 = vpop.f32.mrf.mxu0 }
 0x1b5   : > { %656 = vst [vmem:[#allocation2] sm:$0xff] %v655_v24 }
 0x1b6   : > { %v1055_v26 = vld [vmem:[#allocation11 + $0x38] sm:$0xff]  ;;  %v1054_v27 = vld [vmem:[#allocation11 + $0x30] sm:$0xff]  ;;  %v1053_v28 = vld [vmem:[#allocation11 + $0x28] sm:$0xff] }
 0x1b7   : > { %733 = vmatpush.bf16.msra.mxu0 %v1055_v26  ;;  %v1052_v29 = vld [vmem:[#allocation11 + $0x20] sm:$0xff]  ;;  %v1051_v30 = vld [vmem:[#allocation11 + $0x18] sm:$0xff]  ;;  %v1050_v31 = vld [vmem:[#allocation11 + $0x10] sm:$0xff] }
 0x1b8   : > { %v1049_v32 = vld [vmem:[#allocation11 + $0x8] sm:$0xff]  ;;  %v662_v34 = vld [vmem:[%s462_s19] sm:$0xff]  ;;  %v1048_v36 = vld [vmem:[#allocation11] sm:$0xff] }
 0x1b9   : > { %v1222_v38 = vld [vmem:[%s2119_s2] ss:$0 sm:$0xff] }
 0x1bb   : > { %734 = vmatpush.bf16.msra.mxu0 %v1054_v27 }
 0x1bc   : > { %v661_v33 = vld [vmem:[#allocation2] sm:$0xff] }
 0x1bd   : > { %v663_v35 = vmul.f32 %v662_v34, %v661_v33 }
 0x1bf   : > { %735 = vmatpush.bf16.msra.mxu0 %v1053_v28  ;;  %v664_v37 = vpack.c.bf16 %v663_v35, %v663_v35 }
 0x1c3   : > { %736 = vmatpush.bf16.msra.mxu0 %v1052_v29 }
 0x1c7   : > { %737 = vmatpush.bf16.msra.mxu0 %v1051_v30 }
 0x1cb   : > { %738 = vmatpush.bf16.msra.mxu0 %v1050_v31 }
 0x1cf   : > { %739 = vmatpush.bf16.msra.mxu0 %v1049_v32 }
 0x1d3   : > { %740 = vmatpush.bf16.msra.mxu0 %v1048_v36 }
 0x1d6   : > { %741 = vmatmul.bf16.vlgmr.msra.gmra.mxu0 %v664_v37 }
 0x253   : > { %v742_v39 = vpop.f32.mrf.mxu0 }
 0x254   : > { %v743_v40 = vadd.f32 %v1222_v38, %v742_v39 }
 0x256   : > { %746 = vst [vmem:[%s520_s13] sm:$0xff] %v743_v40 }
 0x25b   : > { %v744_v41 = vpop.f32.mrf.mxu0 }
 0x25c PF: > { %s2120_s12 = sld [smem:[#allocation25_spill]]  ;;  %s760_s1 = sshll.u32 %s520_s13, 4  ;;  %s761_s1 = int_to_ptr.vmem [resolvable:$true] %s760_s1 }
 0x25d   : > { %s2123_s24 = sld [smem:[#allocation41_spill]]  ;;  %s748_s18 = scalar_lea.sflag [#allocation5], %s425_s9 }
 0x262   : > { %s1034_s8 = sshll.u32 %s2120_s12, 3 }
 0x263   : > { %s758_s30 = scalar_lea.hbm %s2123_s24, %s1034_s8  ;;  %s1423_s28 = scalar_lea.hbm %s2123_s24, 16 }
 0x264   : > { %s762_s23 = sshll.u32 %s758_s30, 4  ;;  %s763_s23 = int_to_ptr.hbm [resolvable:$true] %s762_s23 }
 0x265   : > { %s1417_s26 = sshra.s32 %s763_s23, 4  ;;  %s1418_s26 = int_to_ptr.hbm [resolvable:$true] %s1417_s26 }
 0x266   : > { %s1419_s7 = scalar_lea.hbm %s1418_s26, 8  ;;  %p1424_p4 = scmp.lt.s32.totalorder %s1418_s26, %s2123_s24 }
 0x267   : > { %p1420_p11 = scmp.ne.s32.totalorder %s1418_s26, %s1419_s7  ;;  %p1425_p3 = scmp.lt.s32.totalorder %s1423_s28, %s1419_s7 }
 0x269   : > { %p1421_p1 = pnand %p1420_p11, %p1766_p9  ;;  %p1426_p12 = por %p1425_p3, %p1424_p4 }
 0x26b   : > { %p1422_p0 = pneg %p1421_p1 }
 0x26d   : > { %p1427_p8 = pnand %p1426_p12, %p1422_p0 }
 0x26f   : > { %1430 = shalt.err (!%p1427_p8)
}
 0x270   : > { %1072 = dma.vmem_to_hbm [thread:$0]  (%p1766_p9), %s761_s1, 128, %s763_s23, %s748_s18  }
 0x271 PF: > { %s2124_s9 = sld [smem:[#allocation21_spill]]  ;;  %p1103_p2 = scmp.ge.s32.totalorder %s1569_s22, 2 }
 0x273   : > { %p1095_p5 = pnand %p1103_p2, %p1773_p10 }
 0x275   : > { %p1096_p13 = pneg %p1095_p5 }
 0x277   : > { %s774_s13 = sand.u32 1, %s2124_s9  }
 0x278   : > { %s775_s2 = scalar_lea.sflag [#allocation5], %s774_s13 }
 0x279   : > { %1512 = dma.done.wait (%p1096_p13), %s775_s2, 128  }
 0x27a   : > { %1514 = vsyncadd (%p1096_p13), %s775_s2, 4294967168  ;;  %s26_s22 = sadd.s32 1, %s1569_s22   ;;  %s2127_s15 = sld [smem:[#allocation20_spill]] }
 0x27b   : > { %p1992_p7 = scmp.ge.s32.totalorder %s26_s22, 6   ;;  %s2128_s19 = sld [smem:[#allocation29_spill]] }
 0x27c   : > { %s2129_s8 = sld [smem:[#allocation22_spill]]  ;;  %s2135_s30 = smov %s1521_s10 }
 0x27d   : > { %s2130_s16 = sld [smem:[#allocation23_spill]]  ;;  %s2136_s10 = smov %s1525_s11 }
 0x27e   : > { %s2131_s17 = sld [smem:[#allocation30_spill]]  ;;  %s2137_s11 = smov %s1852_s4 }
 0x27f   : > { %s2132_s0 = sld [smem:[#allocation26_spill]]  ;;  %s2139_s13 = smov %s1537_s14 }
 0x280   : > { %s2133_s1 = sld [smem:[#allocation27_spill]]  ;;  %s2138_s12 = smov %s2127_s15 }
 0x281   : > { %s2140_s14 = smov %s2128_s19  ;;  %s2142_s18 = smov %s1561_s20 }
 0x282   : > { %s2141_s15 = smov %s2129_s8  ;;  %s2143_s19 = smov %s1565_s21 }
 0x283   :  { %25 = sbr.rel (!%p1992_p7) target bundleno = 20 (0x14), region = 153 }
 0x285   : > { %s2144_s20 = smov %s2132_s0 }
 0x286   : > { %s2145_s21 = smov %s2133_s1 }
 0x288   :  { %781 = vsyncpa [#allocation4], 1 }
 0x289   :  { %783 = vsyncpa [#allocation4 + $0x1], 1 }
 0x28a   :  { %784 = vsyncpa [#allocation7], 1 }
 0x28b   :  { %785 = vsyncpa [#allocation5], 1 }
 0x28c   :  { %787 = vsyncpa [#allocation5 + $0x1], 1 }

</bundles_post_ra>
